<compile_context>
chip_gen: v5e
topology: v5e:2x2
jax: 0.10.0
libtpu: 0.0.40
codegen_flags: <defaults>
</compile_context>

<pallas_src>
import functools

import jax
import jax.numpy as jnp
from jax import lax
from jax.experimental import pallas as pl
from jax.experimental.pallas import tpu as pltpu


# ----------------------------- Pallas kernels -------------------------------


def _qkv_expand_kernel(x_ref, dm_ref, wq_ref, wk_ref, wv_ref, b_ref,
                       q_ref, k_ref, v_ref):
    # x_ref:  (Tt, Din)   token tile
    # dm_ref: (Tt, 1)     int32 per-token active input width D_m
    # w*_ref: (Dout, Din) full weights in nn.Linear layout (no transpose needed)
    # b_ref:  (3, Dout)   q/k/v biases stacked (zeros if absent)
    x = x_ref[...]
    d_m = dm_ref[...]
    tt, din = x.shape

    col = lax.broadcasted_iota(jnp.int32, (tt, din), 1)
    xm = jnp.where(col < d_m, x, jnp.zeros_like(x))   # mask computed once for q/k/v

    dn = (((1,), (1,)), ((), ()))  # contract x dim1 with w dim1 (trans_b on MXU)

    yq = lax.dot_general(xm, wq_ref[...], dn, preferred_element_type=jnp.float32)
    yk = lax.dot_general(xm, wk_ref[...], dn, preferred_element_type=jnp.float32)
    yv = lax.dot_general(xm, wv_ref[...], dn, preferred_element_type=jnp.float32)

    q_ref[...] = (yq + b_ref[0:1, :]).astype(q_ref.dtype)
    k_ref[...] = (yk + b_ref[1:2, :]).astype(k_ref.dtype)
    v_ref[...] = (yv + b_ref[2:3, :]).astype(v_ref.dtype)


def _contract_kernel(x_ref, dm_ref, w_ref, b_ref, o_ref):
    # Full matmul + bias, then zero output columns >= D_m (matches F.pad of slice).
    x = x_ref[...]
    d_m = dm_ref[...]
    tt = x.shape[0]
    dout = w_ref.shape[0]

    dn = (((1,), (1,)), ((), ()))
    y = lax.dot_general(x, w_ref[...], dn, preferred_element_type=jnp.float32)
    y = y + b_ref[...]

    col = lax.broadcasted_iota(jnp.int32, (tt, dout), 1)
    o_ref[...] = jnp.where(col < d_m, y, jnp.zeros_like(y)).astype(o_ref.dtype)


def _attn_kernel(q_ref, k_ref, v_ref, o_ref, *, num_heads, scale):
    # Blocks are (1, N, D): one batch element, all heads, lane-dense in/out.
    q = q_ref[0]  # (N, D)
    k = k_ref[0]
    v = v_ref[0]
    n, d = q.shape
    hd = d // num_heads

    dn_qk = (((1,), (1,)), ((), ()))  # q @ k.T without materializing a transpose
    outs = []
    for h in range(num_heads):        # static unrolled loop over heads
        lo, hi = h * hd, (h + 1) * hd
        qh = q[:, lo:hi]
        kh = k[:, lo:hi]
        vh = v[:, lo:hi]
        s = lax.dot_general(qh, kh, dn_qk, preferred_element_type=jnp.float32)
        s = s * scale
        s = s - jnp.max(s, axis=-1, keepdims=True)   # f32 softmax (v5e-safe)
        p = jnp.exp(s)
        p = p * pl.reciprocal(jnp.sum(p, axis=-1, keepdims=True), approx=True)
        outs.append(jnp.dot(p, vh, preferred_element_type=jnp.float32))

    # One lane-dense (N, D) store instead of H masked hd-wide partial stores.
    o_ref[0] = jnp.concatenate(outs, axis=-1).astype(o_ref.dtype)


# ----------------------------- wrappers --------------------------------------


def _round_up(x, m):
    return (x + m - 1) // m * m


def _token_tiling(total_tokens, token_tile):
    tile = min(token_tile, _round_up(total_tokens, 8))
    t_pad = _round_up(total_tokens, tile)
    return tile, t_pad


def _active_width(token_mask, dim, num_experts):
    # D_m = dim >> (num_experts - 1 - expert), computed once on the host side.
    expert = token_mask.reshape(-1).astype(jnp.int32)
    shifts = (num_experts - 1) - expert
    return jnp.right_shift(jnp.full_like(expert, dim), shifts).reshape(-1, 1)


def nested_qkv_expand(x, wq, wk, wv, bq, bk, bv, token_mask,
                      num_experts=4, token_tile=256):
    """Fused q/k/v NestedLinearExpand. Returns three (B, N, Dout) arrays."""
    B, N, Din = x.shape
    Dout = wq.shape[0]
    T = B * N
    tile, T_pad = _token_tiling(T, token_tile)

    xf = x.reshape(T, Din)
    d_m = _active_width(token_mask, Din, num_experts)
    if T_pad != T:
        xf = jnp.pad(xf, ((0, T_pad - T), (0, 0)))
        d_m = jnp.pad(d_m, ((0, T_pad - T), (0, 0)), constant_values=Din)

    def _b(b):
        return b if b is not None else jnp.zeros((Dout,), x.dtype)
    bias = jnp.stack([_b(bq), _b(bk), _b(bv)], axis=0)  # (3, Dout)

    tok_spec = pl.BlockSpec((tile, Din), lambda i: (i, 0))
    dm_spec = pl.BlockSpec((tile, 1), lambda i: (i, 0))
    w_spec = pl.BlockSpec((Dout, Din), lambda i: (0, 0))
    b_spec = pl.BlockSpec((3, Dout), lambda i: (0, 0))
    out_spec = pl.BlockSpec((tile, Dout), lambda i: (i, 0))
    out_sds = jax.ShapeDtypeStruct((T_pad, Dout), x.dtype)

    q, k, v = pl.pallas_call(
        _qkv_expand_kernel,
        out_shape=(out_sds, out_sds, out_sds),
        grid=(T_pad // tile,),
        in_specs=[tok_spec, dm_spec, w_spec, w_spec, w_spec, b_spec],
        out_specs=(out_spec, out_spec, out_spec),
        compiler_params=pltpu.CompilerParams(dimension_semantics=("parallel",)),
    )(xf, d_m, wq, wk, wv, bias)

    q = q[:T].reshape(B, N, Dout)
    k = k[:T].reshape(B, N, Dout)
    v = v[:T].reshape(B, N, Dout)
    return q, k, v


def nested_linear_contract(x, w, b, token_mask, num_experts=4, token_tile=256):
    B, N, Din = x.shape
    Dout = w.shape[0]
    T = B * N
    tile, T_pad = _token_tiling(T, token_tile)

    xf = x.reshape(T, Din)
    d_m = _active_width(token_mask, Dout, num_experts)
    if T_pad != T:
        xf = jnp.pad(xf, ((0, T_pad - T), (0, 0)))
        d_m = jnp.pad(d_m, ((0, T_pad - T), (0, 0)), constant_values=Dout)

    bias = (b if b is not None else jnp.zeros((Dout,), x.dtype)).reshape(1, Dout)

    out = pl.pallas_call(
        _contract_kernel,
        out_shape=jax.ShapeDtypeStruct((T_pad, Dout), x.dtype),
        grid=(T_pad // tile,),
        in_specs=[
            pl.BlockSpec((tile, Din), lambda i: (i, 0)),
            pl.BlockSpec((tile, 1), lambda i: (i, 0)),
            pl.BlockSpec((Dout, Din), lambda i: (0, 0)),
            pl.BlockSpec((1, Dout), lambda i: (0, 0)),
        ],
        out_specs=pl.BlockSpec((tile, Dout), lambda i: (i, 0)),
        compiler_params=pltpu.CompilerParams(dimension_semantics=("parallel",)),
    )(xf, d_m, w, bias)
    return out[:T].reshape(B, N, Dout)


def attention_pallas(q, k, v, num_heads):
    # q, k, v, out: (B, N, D) -- heads are split inside the kernel, so no
    # host-side (0,2,1,3) transposes / extra HBM passes are needed.
    B, N, D = q.shape
    hd = D // num_heads
    scale = float(hd) ** -0.5
    spec = pl.BlockSpec((1, N, D), lambda b: (b, 0, 0))
    return pl.pallas_call(
        functools.partial(_attn_kernel, num_heads=num_heads, scale=scale),
        out_shape=jax.ShapeDtypeStruct((B, N, D), q.dtype),
        grid=(B,),
        in_specs=[spec, spec, spec],
        out_specs=spec,
        compiler_params=pltpu.CompilerParams(dimension_semantics=("parallel",)),
    )(q, k, v)


class NestedAttentionPallas:
    """Pallas TPU version of NestedAttention (eval mode, dropout p=0)."""

    def __init__(self, dim, num_heads=8, num_experts=4, qkv_bias=False,
                 proj_bias=True, key=None, token_tile=256):
        assert dim % num_heads == 0
        self.dim = dim
        self.num_heads = num_heads
        self.num_experts = num_experts
        self.token_tile = token_tile
        self.scale = (dim // num_heads) ** -0.5

        key = jax.random.PRNGKey(0) if key is None else key
        ks = jax.random.split(key, 8)
        bound = 1.0 / (dim ** 0.5)

        def uinit(k, shape):
            return jax.random.uniform(k, shape, jnp.float32, -bound, bound)

        self.wq = uinit(ks[0], (dim, dim))
        self.wk = uinit(ks[1], (dim, dim))
        self.wv = uinit(ks[2], (dim, dim))
        self.wproj = uinit(ks[3], (dim, dim))
        self.bq = uinit(ks[4], (dim,)) if qkv_bias else None
        self.bk = uinit(ks[5], (dim,)) if qkv_bias else None
        self.bv = uinit(ks[6], (dim,)) if qkv_bias else None
        self.bproj = uinit(ks[7], (dim,)) if proj_bias else None

    def __call__(self, input_tokens, token_mask):
        E, H = self.num_experts, self.num_heads

        q, k, v = nested_qkv_expand(
            input_tokens, self.wq, self.wk, self.wv,
            self.bq, self.bk, self.bv, token_mask,
            num_experts=E, token_tile=self.token_tile)

        o = attention_pallas(q, k, v, H)                     # (B, N, D), lane-dense

        out = nested_linear_contract(o, self.wproj, self.bproj, token_mask,
                                     num_experts=E, token_tile=self.token_tile)
        return out


# ----------------------------- pure-JAX reference ----------------------------


def _reference_forward(m: NestedAttentionPallas, x, token_mask):
    B, N, D = x.shape
    H, hd, E = m.num_heads, D // m.num_heads, m.num_experts
    em = token_mask.reshape(B * N, 1).astype(jnp.int32)
    col = jnp.arange(D)[None, :]
    d_m = jnp.right_shift(jnp.full_like(em, D), (E - 1) - em)

    def expand(xf, w, b):
        xm = jnp.where(col < d_m, xf, 0.0)
        y = xm @ w.T
        return y + b if b is not None else y

    def contract(xf, w, b):
        y = xf @ w.T
        if b is not None:
            y = y + b
        return jnp.where(col < d_m, y, 0.0)

    xf = x.reshape(B * N, D)
    q = expand(xf, m.wq, m.bq).reshape(B, N, H, hd).transpose(0, 2, 1, 3)
    k = expand(xf, m.wk, m.bk).reshape(B, N, H, hd).transpose(0, 2, 1, 3)
    v = expand(xf, m.wv, m.bv).reshape(B, N, H, hd).transpose(0, 2, 1, 3)

    s = jnp.einsum("bhqd,bhkd->bhqk", q, k) * (hd ** -0.5)
    p = jax.nn.softmax(s, axis=-1)
    o = jnp.einsum("bhqk,bhkd->bhqd", p, v).transpose(0, 2, 1, 3).reshape(B * N, D)
    return contract(o, m.wproj, m.bproj).reshape(B, N, D)


# ----------------------------------- main -------------------------------------


if __name__ == "__main__":
    B, N, D, H, E = 2, 8, 32, 4, 4  # batch, seq, dim, heads, experts (head_dim = 8)

    key = jax.random.PRNGKey(0)
    kx, kmask, kparams = jax.random.split(key, 3)

    x = jax.random.normal(kx, (B, N, D), jnp.float32)
    token_mask = jax.random.randint(kmask, (B, N), 0, E, jnp.int32)

    model = NestedAttentionPallas(dim=D, num_heads=H, num_experts=E,
                                  qkv_bias=False, proj_bias=True, key=kparams)

    out = model(x, token_mask)
    out = jax.block_until_ready(out)

    ref = _reference_forward(model, x, token_mask)
    assert out.shape == (B, N, D)
    # slightly looser tolerance due to pl.reciprocal(approx=True) in the softmax
    assert jnp.allclose(out, ref, atol=2e-3, rtol=2e-3)

    print("KERNEL_OK")
</pallas_src>

<mosaic_0001>
module attributes {stable_mosaic.version = 11 : i64} {
  func.func @_qkv_expand_kernel(%arg0: i32, %arg1: memref<16x32xf32, #tpu.memory_space<vmem>>, %arg2: memref<16x1xi32, #tpu.memory_space<vmem>>, %arg3: memref<32x32xf32, #tpu.memory_space<vmem>>, %arg4: memref<32x32xf32, #tpu.memory_space<vmem>>, %arg5: memref<32x32xf32, #tpu.memory_space<vmem>>, %arg6: memref<3x32xf32, #tpu.memory_space<vmem>>, %arg7: memref<16x32xf32, #tpu.memory_space<vmem>>, %arg8: memref<16x32xf32, #tpu.memory_space<vmem>>, %arg9: memref<16x32xf32, #tpu.memory_space<vmem>>) attributes {dimension_semantics = [#tpu.dimension_semantics<parallel>], iteration_bounds = array<i64: 1>, scalar_prefetch = 0 : i64, scratch_operands = 0 : i64, tpu.core_type = #tpu.core_type<tc>, window_params = [{transform_indices = @transform_0, window_bounds = array<i64: 16, 32>}, {transform_indices = @transform_1, window_bounds = array<i64: 16, 1>}, {pipeline_mode = #tpu.pipeline_mode<synchronous>, transform_indices = @transform_2, window_bounds = array<i64: 32, 32>}, {pipeline_mode = #tpu.pipeline_mode<synchronous>, transform_indices = @transform_3, window_bounds = array<i64: 32, 32>}, {pipeline_mode = #tpu.pipeline_mode<synchronous>, transform_indices = @transform_4, window_bounds = array<i64: 32, 32>}, {pipeline_mode = #tpu.pipeline_mode<synchronous>, transform_indices = @transform_5, window_bounds = array<i64: 3, 32>}, {transform_indices = @transform_6, window_bounds = array<i64: 16, 32>}, {transform_indices = @transform_7, window_bounds = array<i64: 16, 32>}, {transform_indices = @transform_8, window_bounds = array<i64: 16, 32>}]} {
    %c0 = arith.constant 0 : index
    %c0_0 = arith.constant 0 : index
    %0 = vector.load %arg1[%c0, %c0_0] : memref<16x32xf32, #tpu.memory_space<vmem>>, vector<16x32xf32>
    %c0_1 = arith.constant 0 : index
    %c0_2 = arith.constant 0 : index
    %1 = vector.load %arg2[%c0_1, %c0_2] : memref<16x1xi32, #tpu.memory_space<vmem>>, vector<16x1xi32>
    %2 = tpu.iota {dimensions = array<i32: 1>} : vector<16x32xi32>
    %3 = vector.broadcast %1 : vector<16x1xi32> to vector<16x32xi32>
    %4 = arith.cmpi slt, %2, %3 : vector<16x32xi32>
    %cst = arith.constant 0.000000e+00 : f32
    %5 = vector.broadcast %cst : f32 to vector<16x32xf32>
    %6 = arith.select %4, %0, %5 : vector<16x32xi1>, vector<16x32xf32>
    %c0_3 = arith.constant 0 : index
    %c0_4 = arith.constant 0 : index
    %7 = vector.load %arg3[%c0_3, %c0_4] : memref<32x32xf32, #tpu.memory_space<vmem>>, vector<32x32xf32>
    %cst_5 = arith.constant dense<0.000000e+00> : vector<16x32xf32>
    %8 = tpu.matmul %6, %7, %cst_5 {dimension_numbers = #tpu.dot_dimension_numbers<[1], [1], [0], [0], [0, 0, 1, 0], [], []>} : vector<16x32xf32>, vector<32x32xf32>, vector<16x32xf32> -> vector<16x32xf32>
    %c0_6 = arith.constant 0 : index
    %c0_7 = arith.constant 0 : index
    %9 = vector.load %arg4[%c0_6, %c0_7] : memref<32x32xf32, #tpu.memory_space<vmem>>, vector<32x32xf32>
    %cst_8 = arith.constant dense<0.000000e+00> : vector<16x32xf32>
    %10 = tpu.matmul %6, %9, %cst_8 {dimension_numbers = #tpu.dot_dimension_numbers<[1], [1], [0], [0], [0, 0, 1, 0], [], []>} : vector<16x32xf32>, vector<32x32xf32>, vector<16x32xf32> -> vector<16x32xf32>
    %c0_9 = arith.constant 0 : index
    %c0_10 = arith.constant 0 : index
    %11 = vector.load %arg5[%c0_9, %c0_10] : memref<32x32xf32, #tpu.memory_space<vmem>>, vector<32x32xf32>
    %cst_11 = arith.constant dense<0.000000e+00> : vector<16x32xf32>
    %12 = tpu.matmul %6, %11, %cst_11 {dimension_numbers = #tpu.dot_dimension_numbers<[1], [1], [0], [0], [0, 0, 1, 0], [], []>} : vector<16x32xf32>, vector<32x32xf32>, vector<16x32xf32> -> vector<16x32xf32>
    %c0_12 = arith.constant 0 : index
    %c0_13 = arith.constant 0 : index
    %13 = vector.load %arg6[%c0_12, %c0_13] : memref<3x32xf32, #tpu.memory_space<vmem>>, vector<1x32xf32>
    %14 = vector.broadcast %13 : vector<1x32xf32> to vector<16x32xf32>
    %15 = arith.addf %8, %14 : vector<16x32xf32>
    %c0_14 = arith.constant 0 : index
    %c0_15 = arith.constant 0 : index
    %16 = vector.load %arg7[%c0_14, %c0_15] : memref<16x32xf32, #tpu.memory_space<vmem>>, vector<16x32xf32>
    tpu.vector_store %arg7[%c0_14, %c0_15], %15 {strides = array<i32>} : memref<16x32xf32, #tpu.memory_space<vmem>>, vector<16x32xf32>,
    %c1 = arith.constant 1 : index
    %c0_16 = arith.constant 0 : index
    %17 = vector.load %arg6[%c1, %c0_16] : memref<3x32xf32, #tpu.memory_space<vmem>>, vector<1x32xf32>
    %18 = vector.broadcast %17 : vector<1x32xf32> to vector<16x32xf32>
    %19 = arith.addf %10, %18 : vector<16x32xf32>
    %c0_17 = arith.constant 0 : index
    %c0_18 = arith.constant 0 : index
    %20 = vector.load %arg8[%c0_17, %c0_18] : memref<16x32xf32, #tpu.memory_space<vmem>>, vector<16x32xf32>
    tpu.vector_store %arg8[%c0_17, %c0_18], %19 {strides = array<i32>} : memref<16x32xf32, #tpu.memory_space<vmem>>, vector<16x32xf32>,
    %c2 = arith.constant 2 : index
    %c0_19 = arith.constant 0 : index
    %21 = vector.load %arg6[%c2, %c0_19] : memref<3x32xf32, #tpu.memory_space<vmem>>, vector<1x32xf32>
    %22 = vector.broadcast %21 : vector<1x32xf32> to vector<16x32xf32>
    %23 = arith.addf %12, %22 : vector<16x32xf32>
    %c0_20 = arith.constant 0 : index
    %c0_21 = arith.constant 0 : index
    %24 = vector.load %arg9[%c0_20, %c0_21] : memref<16x32xf32, #tpu.memory_space<vmem>>, vector<16x32xf32>
    tpu.vector_store %arg9[%c0_20, %c0_21], %23 {strides = array<i32>} : memref<16x32xf32, #tpu.memory_space<vmem>>, vector<16x32xf32>,
    return
  }
  func.func @transform_0(%arg0: i32) -> (i32, i32) {
    %c0_i32 = arith.constant 0 : i32
    %c0_i32_0 = arith.constant 0 : i32
    return %arg0, %c0_i32 : i32, i32
  }
  func.func @transform_1(%arg0: i32) -> (i32, i32) {
    %c0_i32 = arith.constant 0 : i32
    %c0_i32_0 = arith.constant 0 : i32
    return %arg0, %c0_i32 : i32, i32
  }
  func.func @transform_2(%arg0: i32) -> (i32, i32) {
    %c0_i32 = arith.constant 0 : i32
    %c0_i32_0 = arith.constant 0 : i32
    %c0_i32_1 = arith.constant 0 : i32
    return %c0_i32, %c0_i32_0 : i32, i32
  }
  func.func @transform_3(%arg0: i32) -> (i32, i32) {
    %c0_i32 = arith.constant 0 : i32
    %c0_i32_0 = arith.constant 0 : i32
    %c0_i32_1 = arith.constant 0 : i32
    return %c0_i32, %c0_i32_0 : i32, i32
  }
  func.func @transform_4(%arg0: i32) -> (i32, i32) {
    %c0_i32 = arith.constant 0 : i32
    %c0_i32_0 = arith.constant 0 : i32
    %c0_i32_1 = arith.constant 0 : i32
    return %c0_i32, %c0_i32_0 : i32, i32
  }
  func.func @transform_5(%arg0: i32) -> (i32, i32) {
    %c0_i32 = arith.constant 0 : i32
    %c0_i32_0 = arith.constant 0 : i32
    %c0_i32_1 = arith.constant 0 : i32
    return %c0_i32, %c0_i32_0 : i32, i32
  }
  func.func @transform_6(%arg0: i32) -> (i32, i32) {
    %c0_i32 = arith.constant 0 : i32
    %c0_i32_0 = arith.constant 0 : i32
    return %arg0, %c0_i32 : i32, i32
  }
  func.func @transform_7(%arg0: i32) -> (i32, i32) {
    %c0_i32 = arith.constant 0 : i32
    %c0_i32_0 = arith.constant 0 : i32
    return %arg0, %c0_i32 : i32, i32
  }
  func.func @transform_8(%arg0: i32) -> (i32, i32) {
    %c0_i32 = arith.constant 0 : i32
    %c0_i32_0 = arith.constant 0 : i32
    return %arg0, %c0_i32 : i32, i32
  }
}

</mosaic_0001>

<bundles_post_ra>
// kernel: tpu_custom_call.1
= control target key start
LH: loop header
LB: loop body
LE: loop exit
PB: predicated region body
PF: predicated region fallthrough
CT: control target
= control target key end

     0   :  { %14 = vsyncpa [#allocation3], 0  ;;  %s608_s0 = inlined_call_operand.vmem [shape: f32[16,32], index: 0, kind: input, shape index: {}]   ;;  %s609_s1 = inlined_call_operand.vmem [shape: s32[16,1], index: 1, kind: input, shape index: {}]   ;;  %s610_s2 = inlined_call_operand.hbm [shape: f32[32,32], index: 2, kind: input, shape index: {}]   ;;  %s611_s3 = inlined_call_operand.hbm [shape: f32[32,32], index: 3, kind: input, shape index: {}]   ;;  %s612_s4 = inlined_call_operand.hbm [shape: f32[32,32], index: 4, kind: input, shape index: {}]   ;;  %s613_s5 = inlined_call_operand.vmem [shape: f32[3,32], index: 5, kind: input, shape index: {}]   ;;  %s614_s6 = inlined_call_operand.hbm [shape: f32[16,32], index: 6, kind: output, shape index: {0}]   ;;  %s615_s7 = inlined_call_operand.hbm [shape: f32[16,32], index: 7, kind: output, shape index: {1}]   ;;  %s616_s8 = inlined_call_operand.hbm [shape: f32[16,32], index: 8, kind: output, shape index: {2}]  }
   0x1   :  { %15 = vsyncpa [#allocation6], 0 }
   0x2   :  { %16 = vsyncpa [#allocation4], 0 }
   0x3   :  { %17 = vsyncpa [#allocation10], 0  ;;  %s39_s29 = sshll.u32 %s611_s3, 4  ;;  %s469_s30 = smov [#allocation5]   ;;  %s40_s29 = int_to_ptr.hbm [resolvable:$true] %s39_s29 }
   0x4   :  { %s41_s9 = sshll.u32 %s469_s30, 4  ;;  %s26_s12 = sshll.u32 %s610_s2, 4  ;;  %s42_s9 = int_to_ptr.vmem [resolvable:$true] %s41_s9  ;;  %s27_s12 = int_to_ptr.hbm [resolvable:$true] %s26_s12 }
   0x5   :  { %s470_s13 = smov 128   ;;  %s471_s14 = smov 8  }
   0x6   :  { %47 = dma.hbm_to_vmem [thread:$0]  %s40_s29, 512, %s42_s9, [#allocation6], %s470_s13, %s470_s13, %s471_s14  }
   0x7   :  { %s472_s15 = smov [#allocation2]   ;;  %s52_s3 = sshll.u32 %s612_s4, 4  ;;  %s53_s3 = int_to_ptr.hbm [resolvable:$true] %s52_s3 }
   0x8   :  { %s28_s16 = sshll.u32 %s472_s15, 4  ;;  %s473_s2 = smov [#allocation7]   ;;  %s29_s16 = int_to_ptr.vmem [resolvable:$true] %s28_s16 }
   0x9   :  { %34 = dma.hbm_to_vmem [thread:$0]  %s27_s12, 512, %s29_s16, [#allocation3], %s470_s13, %s470_s13, %s471_s14  }
   0xa   :  { %s54_s19 = sshll.u32 %s473_s2, 4  ;;  %s55_s19 = int_to_ptr.vmem [resolvable:$true] %s54_s19 }
   0xb   :  { %60 = dma.hbm_to_vmem [thread:$0]  %s53_s3, 512, %s55_s19, [#allocation6], %s470_s13, %s470_s13, %s471_s14  }
   0xc   :  { %461 = dma.done.wait [#allocation3], 512  }
   0xd   :  { %462 = vsyncadd [#allocation3], 4294966784 }
   0xe   :  { %463 = dma.done.wait [#allocation6], 1024  }
   0xf   :  { %464 = vsyncadd [#allocation6], 4294966272  ;;  %v474_v0 = vmov 0   ;;  %vm105_vm0 = vcmask 261120   ;;  %v77_v1 = vld [vmem:[%s609_s1] sm:$0xff]  ;;  %v94_v2 = vld [vmem:[#allocation2 + $0x18] sm:$0xff]  ;;  %v79_v15 = vlaneseq }
  0x10   :  { %313 = vset.pattern.permute.xlu0 %v474_v0  ;;  %282 = vmatpush.xpose.msk.msra.mxu0 %vm105_vm0, %v94_v2  ;;  %v98_v3 = vld [vmem:[#allocation5 + $0x18] sm:$0xff]  ;;  %v93_v5 = vld [vmem:[#allocation2 + $0x10] sm:$0xff]  ;;  %v78_v8 = vld [vmem:[%s609_s1 + $0x8] sm:$0xff]  ;;  %s475_s9 = smov [#allocation9]   ;;  %s246_s15 = sshll.u32 %s615_s7, 4  ;;  %s247_s15 = int_to_ptr.hbm [resolvable:$true] %s246_s15 }
  0x11   :  { %82 = vperm.xlu0 %313, %v77_v1   ;;  %v102_v4 = vld [vmem:[#allocation7 + $0x18] sm:$0xff]  ;;  %288 = vmatpush.xpose.msk.msra.mxu1 %vm105_vm0, %v98_v3  ;;  %v97_v6 = vld [vmem:[#allocation5 + $0x10] sm:$0xff]  ;;  %v92_v9 = vld [vmem:[#allocation2 + $0x8] sm:$0xff]  ;;  %v80_v16 = vand.u32 127, %v79_v15  ;;  %s244_s10 = sshll.u32 %s475_s9, 4  ;;  %s476_s16 = smov [#allocation8]   ;;  %s245_s10 = int_to_ptr.vmem [resolvable:$true] %s244_s10 }
  0x12   :  { %294 = vmatpush.xpose.msk.msra.mxu2 %vm105_vm0, %v102_v4  ;;  %v101_v7 = vld [vmem:[#allocation7 + $0x10] sm:$0xff]  ;;  %300 = vmatpush.xpose.msk.msra.mxu3 %vm105_vm0, %v94_v2  ;;  %v96_v10 = vld [vmem:[#allocation5 + $0x8] sm:$0xff]  ;;  %v91_v12 = vld [vmem:[#allocation2] sm:$0xff]  ;;  %s231_s17 = sshll.u32 %s476_s16, 4  ;;  %s233_s3 = sshll.u32 %s614_s6, 4  ;;  %s232_s17 = int_to_ptr.vmem [resolvable:$true] %s231_s17  ;;  %s234_s3 = int_to_ptr.hbm [resolvable:$true] %s233_s3 }
  0x13   :  { %v100_v11 = vld [vmem:[#allocation7 + $0x8] sm:$0xff]  ;;  %v95_v13 = vld [vmem:[#allocation5] sm:$0xff]  ;;  %s477_s7 = smov [#allocation11]   ;;  %s259_s20 = sshll.u32 %s616_s8, 4  ;;  %s260_s20 = int_to_ptr.hbm [resolvable:$true] %s259_s20 }
  0x14   :  { %283 = vmatpush.xpose.msk.msra.mxu0 %vm105_vm0, %v93_v5  ;;  %v99_v14 = vld [vmem:[#allocation7] sm:$0xff]  ;;  %v76_v20 = vld [vmem:[%s608_s0 + $0x8] sm:$0xff]  ;;  %s257_s2 = sshll.u32 %s477_s7, 4  ;;  %s258_s2 = int_to_ptr.vmem [resolvable:$true] %s257_s2 }
  0x15   :  { %289 = vmatpush.xpose.msk.msra.mxu1 %vm105_vm0, %v97_v6  ;;  %v75_v17 = vld [vmem:[%s608_s0] sm:$0xff] }
  0x16   :  { %295 = vmatpush.xpose.msk.msra.mxu2 %vm105_vm0, %v101_v7  ;;  %301 = vmatpush.xpose.msk.msra.mxu3 %vm105_vm0, %v93_v5  ;;  %v314_v23 = vld [vmem:[%s613_s5] ss:$0 sm:$0xff]  ;;  %v315_v24 = vld [vmem:[%s613_s5 + $0x1] ss:$0 sm:$0xff]  ;;  %v316_v29 = vld [vmem:[%s613_s5 + $0x2] ss:$0 sm:$0xff] }
  0x18   :  { %284 = vmatpush.xpose.msk.msra.mxu0 %vm105_vm0, %v92_v9 }
  0x19   :  { %85 = vperm.xlu0 %313, %v78_v8   ;;  %290 = vmatpush.xpose.msk.msra.mxu1 %vm105_vm0, %v96_v10 }
  0x1a   :  { %296 = vmatpush.xpose.msk.msra.mxu2 %vm105_vm0, %v100_v11  ;;  %302 = vmatpush.xpose.msk.msra.mxu3 %vm105_vm0, %v92_v9 }
  0x1c   :  { %285 = vmatpush.xpose.msk.msra.mxu0 %vm105_vm0, %v91_v12 }
  0x1d   :  { %291 = vmatpush.xpose.msk.msra.mxu1 %vm105_vm0, %v95_v13 }
  0x1e   :  { %297 = vmatpush.xpose.msk.msra.mxu2 %vm105_vm0, %v99_v14  ;;  %303 = vmatpush.xpose.msk.msra.mxu3 %vm105_vm0, %v91_v12 }
  0x83   :  { %v83_v18 = vpop.permute.xlu0 %82 }
  0x84   :  { %vm87_vm1 = vcmp.lt.s32.totalorder %v80_v16, %v83_v18 }
  0x85   :  { %v89_v19 = vsel %vm87_vm1, %v75_v17, 0.0 }
  0x86   :  { %286 = vmatmul.msk.f32.vlgmr.msra.gmra.mxu0 %vm105_vm0, %v89_v19  ;;  %292 = vmatmul.msk.f32.vlgmr.msra.gmra.mxu1 %vm105_vm0, %v89_v19 }
  0x87   :  { %298 = vmatmul.msk.f32.vlgmr.msra.gmra.mxu2 %vm105_vm0, %v89_v19 }
  0x8b   :  { %v86_v21 = vpop.permute.xlu0 %85 }
  0x8c   :  { %vm88_vm2 = vcmp.lt.s32.totalorder %v80_v16, %v86_v21 }
  0x8d   :  { %v90_v22 = vsel %vm88_vm2, %v76_v20, 0.0 }
  0x8e   :  { %287 = vmatmul.msk.f32.vlgmr.msra.gmra.mxu3 %vm105_vm0, %v90_v22  ;;  %293 = vmatmul.msk.f32.gmra.mxu1 %vm105_vm0, %v90_v22 }
  0x8f   :  { %299 = vmatmul.msk.f32.gmra.mxu2 %vm105_vm0, %v90_v22 }
 0x103   :  { %v141_v25 = vpop.f32.mrf.mxu0  ;;  %v180_v26 = vpop.f32.mrf.mxu1 }
 0x104   :  { %v142_v27 = vadd.f32 %v314_v23, %v141_v25  ;;  %v181_v28 = vadd.f32 %v315_v24, %v180_v26 }
 0x106   :  { %147 = vst.msk [vmem:[#allocation8] sm:$0xff] %vm105_vm0, %v142_v27 }
 0x107   :  { %186 = vst.msk [vmem:[#allocation9] sm:$0xff] %vm105_vm0, %v181_v28 }
 0x10a   :  { %v219_v30 = vpop.f32.mrf.mxu2 }
 0x10b   :  { %v220_v31 = vadd.f32 %v316_v29, %v219_v30  ;;  %v183_v32 = vpop.f32.mrf.mxu1 }
 0x10c   :  { %v184_v33 = vadd.f32 %v315_v24, %v183_v32 }
 0x10d   :  { %225 = vst.msk [vmem:[#allocation11] sm:$0xff] %vm105_vm0, %v220_v31 }
 0x10e   :  { %187 = vst.msk [vmem:[#allocation9 + $0x8] sm:$0xff] %vm105_vm0, %v184_v33 }
 0x10f   :  { %252 = dma.vmem_to_hbm [thread:$0]  %s245_s10, 256, %s247_s15, [#allocation10], %s470_s13, %s470_s13, %s471_s14  }
 0x111   :  { %v144_v34 = vpop.f32.mrf.mxu3 }
 0x112   :  { %v145_v35 = vadd.f32 %v314_v23, %v144_v34  ;;  %v222_v36 = vpop.f32.mrf.mxu2 }
 0x113   :  { %v223_v37 = vadd.f32 %v316_v29, %v222_v36 }
 0x114   :  { %148 = vst.msk [vmem:[#allocation8 + $0x8] sm:$0xff] %vm105_vm0, %v145_v35 }
 0x115   :  { %226 = vst.msk [vmem:[#allocation11 + $0x8] sm:$0xff] %vm105_vm0, %v223_v37  ;;  %239 = dma.vmem_to_hbm [thread:$0]  %s232_s17, 256, %s234_s3, [#allocation4], %s470_s13, %s470_s13, %s471_s14  }
 0x116   :  { %265 = dma.vmem_to_hbm [thread:$0]  %s258_s2, 256, %s260_s20, [#allocation10], %s470_s13, %s470_s13, %s471_s14  }
 0x117   :  { %465 = dma.done.wait [#allocation4], 256  }
 0x118   :  { %466 = vsyncadd [#allocation4], 4294967040 }
 0x119   :  { %467 = dma.done.wait [#allocation10], 512  }
 0x11a   :  { %468 = vsyncadd [#allocation10], 4294966784 }
 0x11b   :  { %278 = vsyncpa [#allocation3], 1 }
 0x11c   :  { %279 = vsyncpa [#allocation6], 1 }
 0x11d   :  { %280 = vsyncpa [#allocation4], 1 }
 0x11e   :  { %281 = vsyncpa [#allocation10], 1 }

</bundles_post_ra>
